<compile_context>
chip_gen: v6e
topology: v6e:2x2x1
jax: 0.10.0
libtpu: 0.0.40
codegen_flags: <defaults>
</compile_context>

<pallas_src>
import math

import jax
import jax.numpy as jnp
from jax import lax
from jax.experimental import pallas as pl
from jax.experimental.pallas import tpu as pltpu

BN_EPS = 1e-5


def _attentive_transformer_kernel(w_ref, gamma_ref, beta_ref, x_ref,
                                  prior_t_ref, out_t_ref):
    """One ghost-batch chunk, transposed (lane-dense) layout.

    w_ref      : [C_out, C_in]   PyTorch Linear weight (broadcast over chunks)
    gamma_ref  : [C_out, 1]      BN weight
    beta_ref   : [C_out, 1]      BN bias
    x_ref      : [chunk, C_in]   input rows of this ghost chunk
    prior_t_ref: [C_out, chunk]  prior, transposed (batch on lanes)
    out_t_ref  : [C_out, chunk]  output mask, transposed (batch on lanes)
    """
    # Linear (bias=False) with trans_b on the MXU: native-dtype operands,
    # f32 accumulation.  y_t[c, n] = sum_k W[c, k] * x[n, k]
    y = lax.dot_general(
        w_ref[...], x_ref[...],
        dimension_numbers=(((1,), (1,)), ((), ())),
        preferred_element_type=jnp.float32)              # [C_out, chunk] f32

    # Training-mode BatchNorm1d over this ghost chunk: per-feature (sublane)
    # stats reduced over the batch (lane) axis; biased variance, eps inside.
    inv_n = 1.0 / y.shape[1]
    mean = jnp.sum(y, axis=1, keepdims=True) * inv_n
    centered = y - mean
    var = jnp.sum(centered * centered, axis=1, keepdims=True) * inv_n
    # Fold gamma into the rsqrt scale: one fewer full-tile multiply.
    scale = gamma_ref[...].astype(jnp.float32) * lax.rsqrt(var + BN_EPS)
    y = centered * scale + beta_ref[...].astype(jnp.float32)

    # prior * y  (elementwise math stays in f32)
    y = prior_t_ref[...].astype(jnp.float32) * y

    # softmax over features (the sublane axis in this layout)
    m = jnp.max(y, axis=0, keepdims=True)
    e = jnp.exp(y - m)
    s = jnp.sum(e, axis=0, keepdims=True)
    out_t_ref[...] = (e * pl.reciprocal(s, approx=True)).astype(out_t_ref.dtype)


def _ghost_chunking(n, virtual_batch_size):
    """torch.chunk(x, ceil(n / vbs)) chunk geometry."""
    num_chunks = max(1, math.ceil(n / virtual_batch_size))
    chunk = math.ceil(n / num_chunks)
    return num_chunks, chunk


def attentive_transformer_t(x, w, gamma, beta, prior_t, *,
                            virtual_batch_size=512):
    """Lane-dense AttentiveTransformer forward.

    x      : [N, C_in]
    w      : [C_out, C_in]  (PyTorch Linear layout; NOT transposed here)
    gamma  : [C_out]        BN weight
    beta   : [C_out]        BN bias
    prior_t: [C_out, N]     prior in the transposed (lane-dense) layout
    returns: [C_out, N]     softmax attention mask in the transposed layout
    """
    x = jnp.asarray(x)
    w = jnp.asarray(w)
    prior_t = jnp.asarray(prior_t)
    n, cin = x.shape
    cout, cin_w = w.shape
    assert cin == cin_w and prior_t.shape == (cout, n)

    num_chunks, chunk = _ghost_chunking(n, virtual_batch_size)
    if num_chunks > 1:
        # TODO(synk): ragged / non-128-aligned ghost chunks need masked BN
        # statistics inside the kernel; only equal, lane-aligned chunks grid.
        assert n % chunk == 0 and chunk % 128 == 0, (
            "multi-chunk GhostBatchNorm requires N to split into equal chunks "
            "that are a multiple of 128")

    # In a real training loop, pre-shape the BN params to [C_out, 1] once
    # outside the loop instead of per call.
    gamma_col = jnp.asarray(gamma, jnp.float32).reshape(cout, 1)
    beta_col = jnp.asarray(beta, jnp.float32).reshape(cout, 1)

    itemsize = x.dtype.itemsize
    cost = pl.CostEstimate(
        flops=2 * n * cin * cout + 8 * n * cout,
        transcendentals=n * cout + n + num_chunks * cout,
        bytes_accessed=(x.size + w.size) * itemsize
        + prior_t.size * prior_t.dtype.itemsize
        + 2 * cout * 4 + n * cout * itemsize)

    return pl.pallas_call(
        _attentive_transformer_kernel,
        out_shape=jax.ShapeDtypeStruct((cout, n), x.dtype),
        grid=(num_chunks,),
        in_specs=[
            pl.BlockSpec((cout, cin), lambda i: (0, 0)),    # W (broadcast)
            pl.BlockSpec((cout, 1), lambda i: (0, 0)),      # gamma
            pl.BlockSpec((cout, 1), lambda i: (0, 0)),      # beta
            pl.BlockSpec((chunk, cin), lambda i: (i, 0)),   # x ghost chunk
            pl.BlockSpec((cout, chunk), lambda i: (0, i)),  # prior^T chunk
        ],
        out_specs=pl.BlockSpec((cout, chunk), lambda i: (0, i)),
        compiler_params=pltpu.CompilerParams(
            dimension_semantics=("parallel",)),
        cost_estimate=cost,
    )(w, gamma_col, beta_col, x, prior_t)


def attentive_transformer(x, w, gamma, beta, prior, *, virtual_batch_size=512):
    """PyTorch-layout compatibility wrapper: prior / result are [N, C_out].

    Prefer attentive_transformer_t and keep the lane-dense [C_out, N] layout
    end to end in the TabNet pipeline; the transposes here exist only for
    interface parity with the torch module.
    """
    out_t = attentive_transformer_t(x, w, gamma, beta, jnp.asarray(prior).T,
                                    virtual_batch_size=virtual_batch_size)
    return out_t.T


# TODO(synk): running-mean/var (momentum) BatchNorm statistics are not computed
# or returned -- this kernel is a training-mode forward only.


def _reference(x, w, gamma, beta, prior, virtual_batch_size=512):
    """Pure-JAX reference mirroring the PyTorch module (training mode)."""
    y = x @ w.T
    n = y.shape[0]
    _, chunk = _ghost_chunking(n, virtual_batch_size)
    parts = []
    for s in range(0, n, chunk):
        yc = y[s:s + chunk]
        mean = jnp.mean(yc, axis=0, keepdims=True)
        var = jnp.mean((yc - mean) ** 2, axis=0, keepdims=True)
        parts.append((yc - mean) / jnp.sqrt(var + BN_EPS))
    y = jnp.concatenate(parts, axis=0)
    y = y * gamma[None, :] + beta[None, :]
    y = prior * y
    return jax.nn.softmax(y, axis=-1)


if __name__ == "__main__":
    key = jax.random.PRNGKey(0)
    k_x, k_w, k_g, k_b, k_p, k_x2, k_p2 = jax.random.split(key, 7)

    C_IN, C_OUT = 32, 16
    bound = 1.0 / math.sqrt(C_IN)
    w = jax.random.uniform(k_w, (C_OUT, C_IN), jnp.float32, -bound, bound)
    gamma = 1.0 + 0.1 * jax.random.normal(k_g, (C_OUT,), jnp.float32)
    beta = 0.1 * jax.random.normal(k_b, (C_OUT,), jnp.float32)

    # --- 1) single ghost chunk (N <= virtual_batch_size), f32 ---
    N = 64
    x = jax.random.normal(k_x, (N, C_IN), jnp.float32)
    prior = jax.random.uniform(k_p, (N, C_OUT), jnp.float32)
    out = jax.block_until_ready(attentive_transformer(x, w, gamma, beta, prior))
    ref = _reference(x, w, gamma, beta, prior)
    assert out.shape == (N, C_OUT)
    assert jnp.allclose(out, ref, atol=1e-3, rtol=1e-3), "single-chunk mismatch"

    # --- 2) multi ghost-chunk grid (2 chunks of 128), f32 ---
    N2, VBS = 256, 128
    x2 = jax.random.normal(k_x2, (N2, C_IN), jnp.float32)
    prior2 = jax.random.uniform(k_p2, (N2, C_OUT), jnp.float32)
    out2 = jax.block_until_ready(
        attentive_transformer(x2, w, gamma, beta, prior2,
                              virtual_batch_size=VBS))
    ref2 = _reference(x2, w, gamma, beta, prior2, virtual_batch_size=VBS)
    assert out2.shape == (N2, C_OUT)
    assert jnp.allclose(out2, ref2, atol=1e-3, rtol=1e-3), "multi-chunk mismatch"

    # --- 3) bf16 inputs go straight to the MXU (f32 accumulation) ---
    out_bf = jax.block_until_ready(
        attentive_transformer(x.astype(jnp.bfloat16), w.astype(jnp.bfloat16),
                              gamma, beta, prior.astype(jnp.bfloat16)))
    assert out_bf.dtype == jnp.bfloat16
    assert jnp.allclose(out_bf.astype(jnp.float32), ref,
                        atol=5e-2, rtol=5e-2), "bf16 mismatch"

    print("KERNEL_OK")
</pallas_src>

<mosaic_0001>
module attributes {stable_mosaic.version = 11 : i64} {
  func.func @_attentive_transformer_kernel(%arg0: i32, %arg1: memref<16x32xf32, #tpu.memory_space<vmem>>, %arg2: memref<16x1xf32, #tpu.memory_space<vmem>>, %arg3: memref<16x1xf32, #tpu.memory_space<vmem>>, %arg4: memref<64x32xf32, #tpu.memory_space<vmem>>, %arg5: memref<16x64xf32, #tpu.memory_space<vmem>>, %arg6: memref<16x64xf32, #tpu.memory_space<vmem>>) attributes {dimension_semantics = [#tpu.dimension_semantics<parallel>], iteration_bounds = array<i64: 1>, scalar_prefetch = 0 : i64, scratch_operands = 0 : i64, tpu.core_type = #tpu.core_type<tc>, window_params = [{pipeline_mode = #tpu.pipeline_mode<synchronous>, transform_indices = @transform_0, window_bounds = array<i64: 16, 32>}, {pipeline_mode = #tpu.pipeline_mode<synchronous>, transform_indices = @transform_1, window_bounds = array<i64: 16, 1>}, {pipeline_mode = #tpu.pipeline_mode<synchronous>, transform_indices = @transform_2, window_bounds = array<i64: 16, 1>}, {transform_indices = @transform_3, window_bounds = array<i64: 64, 32>}, {transform_indices = @transform_4, window_bounds = array<i64: 16, 64>}, {transform_indices = @transform_5, window_bounds = array<i64: 16, 64>}]} {
    %c0 = arith.constant 0 : index
    %c0_0 = arith.constant 0 : index
    %0 = vector.load %arg1[%c0, %c0_0] : memref<16x32xf32, #tpu.memory_space<vmem>>, vector<16x32xf32>
    %c0_1 = arith.constant 0 : index
    %c0_2 = arith.constant 0 : index
    %1 = vector.load %arg4[%c0_1, %c0_2] : memref<64x32xf32, #tpu.memory_space<vmem>>, vector<64x32xf32>
    %cst = arith.constant dense<0.000000e+00> : vector<16x64xf32>
    %2 = tpu.matmul %0, %1, %cst {dimension_numbers = #tpu.dot_dimension_numbers<[1], [1], [0], [0], [0, 0, 1, 0], [], []>} : vector<16x32xf32>, vector<64x32xf32>, vector<16x64xf32> -> vector<16x64xf32>
    %cst_3 = arith.constant dense<0.000000e+00> : vector<16xf32>
    %3 = vector.multi_reduction <add>, %2, %cst_3 [1] : vector<16x64xf32> to vector<16xf32>
    %4 = vector.shape_cast %3 : vector<16xf32> to vector<16x1xf32>
    %cst_4 = arith.constant 1.562500e-02 : f32
    %5 = vector.broadcast %cst_4 : f32 to vector<16x1xf32>
    %6 = arith.mulf %4, %5 : vector<16x1xf32>
    %7 = vector.broadcast %6 : vector<16x1xf32> to vector<16x64xf32>
    %8 = arith.subf %2, %7 : vector<16x64xf32>
    %9 = arith.mulf %8, %8 : vector<16x64xf32>
    %cst_5 = arith.constant dense<0.000000e+00> : vector<16xf32>
    %10 = vector.multi_reduction <add>, %9, %cst_5 [1] : vector<16x64xf32> to vector<16xf32>
    %11 = vector.shape_cast %10 : vector<16xf32> to vector<16x1xf32>
    %cst_6 = arith.constant 1.562500e-02 : f32
    %12 = vector.broadcast %cst_6 : f32 to vector<16x1xf32>
    %13 = arith.mulf %11, %12 : vector<16x1xf32>
    %c0_7 = arith.constant 0 : index
    %c0_8 = arith.constant 0 : index
    %14 = vector.load %arg2[%c0_7, %c0_8] : memref<16x1xf32, #tpu.memory_space<vmem>>, vector<16x1xf32>
    %cst_9 = arith.constant 9.99999974E-6 : f32
    %15 = vector.broadcast %cst_9 : f32 to vector<16x1xf32>
    %16 = arith.addf %13, %15 : vector<16x1xf32>
    %17 = math.rsqrt %16 : vector<16x1xf32>
    %18 = arith.mulf %14, %17 : vector<16x1xf32>
    %19 = vector.broadcast %18 : vector<16x1xf32> to vector<16x64xf32>
    %20 = arith.mulf %8, %19 : vector<16x64xf32>
    %c0_10 = arith.constant 0 : index
    %c0_11 = arith.constant 0 : index
    %21 = vector.load %arg3[%c0_10, %c0_11] : memref<16x1xf32, #tpu.memory_space<vmem>>, vector<16x1xf32>
    %22 = vector.broadcast %21 : vector<16x1xf32> to vector<16x64xf32>
    %23 = arith.addf %20, %22 : vector<16x64xf32>
    %c0_12 = arith.constant 0 : index
    %c0_13 = arith.constant 0 : index
    %24 = vector.load %arg5[%c0_12, %c0_13] : memref<16x64xf32, #tpu.memory_space<vmem>>, vector<16x64xf32>
    %25 = arith.mulf %24, %23 : vector<16x64xf32>
    %cst_14 = arith.constant dense<0xFF800000> : vector<64xf32>
    %26 = vector.multi_reduction <maximumf>, %25, %cst_14 [0] : vector<16x64xf32> to vector<64xf32>
    %27 = vector.shape_cast %26 : vector<64xf32> to vector<1x64xf32>
    %28 = vector.broadcast %27 : vector<1x64xf32> to vector<16x64xf32>
    %29 = arith.subf %25, %28 : vector<16x64xf32>
    %30 = math.exp %29 : vector<16x64xf32>
    %cst_15 = arith.constant dense<0.000000e+00> : vector<64xf32>
    %31 = vector.multi_reduction <add>, %30, %cst_15 [0] : vector<16x64xf32> to vector<64xf32>
    %32 = vector.shape_cast %31 : vector<64xf32> to vector<1x64xf32>
    %33 = tpu.reciprocal %32 {approx = true} : vector<1x64xf32> -> vector<1x64xf32>
    %34 = vector.broadcast %33 : vector<1x64xf32> to vector<16x64xf32>
    %35 = arith.mulf %30, %34 : vector<16x64xf32>
    %c0_16 = arith.constant 0 : index
    %c0_17 = arith.constant 0 : index
    %36 = vector.load %arg6[%c0_16, %c0_17] : memref<16x64xf32, #tpu.memory_space<vmem>>, vector<16x64xf32>
    tpu.vector_store %arg6[%c0_16, %c0_17], %35 {strides = array<i32>} : memref<16x64xf32, #tpu.memory_space<vmem>>, vector<16x64xf32>,
    return
  }
  func.func @transform_0(%arg0: i32) -> (i32, i32) {
    %c0_i32 = arith.constant 0 : i32
    %c0_i32_0 = arith.constant 0 : i32
    %c0_i32_1 = arith.constant 0 : i32
    return %c0_i32, %c0_i32_0 : i32, i32
  }
  func.func @transform_1(%arg0: i32) -> (i32, i32) {
    %c0_i32 = arith.constant 0 : i32
    %c0_i32_0 = arith.constant 0 : i32
    %c0_i32_1 = arith.constant 0 : i32
    return %c0_i32, %c0_i32_0 : i32, i32
  }
  func.func @transform_2(%arg0: i32) -> (i32, i32) {
    %c0_i32 = arith.constant 0 : i32
    %c0_i32_0 = arith.constant 0 : i32
    %c0_i32_1 = arith.constant 0 : i32
    return %c0_i32, %c0_i32_0 : i32, i32
  }
  func.func @transform_3(%arg0: i32) -> (i32, i32) {
    %c0_i32 = arith.constant 0 : i32
    %c0_i32_0 = arith.constant 0 : i32
    return %arg0, %c0_i32 : i32, i32
  }
  func.func @transform_4(%arg0: i32) -> (i32, i32) {
    %c0_i32 = arith.constant 0 : i32
    %c0_i32_0 = arith.constant 0 : i32
    return %c0_i32, %arg0 : i32, i32
  }
  func.func @transform_5(%arg0: i32) -> (i32, i32) {
    %c0_i32 = arith.constant 0 : i32
    %c0_i32_0 = arith.constant 0 : i32
    return %c0_i32, %arg0 : i32, i32
  }
}

</mosaic_0001>

<bundles_post_ra>
// kernel: tpu_custom_call.1
= control target key start
LH: loop header
LB: loop body
LE: loop exit
PB: predicated region body
PF: predicated region fallthrough
CT: control target
= control target key end

     0   :  { %vm31_vm0 = vcmask 261120   ;;  %s431_s0 = inlined_call_operand.vmem [shape: f32[16,32], index: 0, kind: input, shape index: {}]   ;;  %s432_s1 = inlined_call_operand.vmem [shape: f32[16,1], index: 1, kind: input, shape index: {}]   ;;  %s433_s2 = inlined_call_operand.vmem [shape: f32[16,1], index: 2, kind: input, shape index: {}]   ;;  %s434_s3 = inlined_call_operand.vmem [shape: f32[64,32], index: 3, kind: input, shape index: {}]   ;;  %s435_s4 = inlined_call_operand.vmem [shape: f32[16,64], index: 4, kind: input, shape index: {}]   ;;  %s436_s5 = inlined_call_operand.hbm [shape: f32[16,64], index: 5, kind: output, shape index: {}]  }
   0x1   :  { %v30_v0 = vld [vmem:[%s434_s3 + $0x38] sm:$0xff]  ;;  %v29_v1 = vld [vmem:[%s434_s3 + $0x30] sm:$0xff]  ;;  %v21_v2 = vld [vmem:[%s431_s0] sm:$0xff] }
   0x2   :  { %261 = vmatprep.subr.msk.mxu0 %vm31_vm0, %v30_v0  ;;  %277 = vmatprep.mubr.msk.f32.mxu0 %vm31_vm0, %v21_v2 }
   0x3   :  { %262 = vmatpush3.xpose.msk.msra.mxu0 %vm31_vm0, %v30_v0 }
   0x4   :  { %263 = vmatprep.subr.msk.mxu0 %vm31_vm0, %v29_v1 }
   0x5   :  { %10 = vsyncpa [#allocation3], 0  ;;  %v28_v3 = vld [vmem:[%s434_s3 + $0x28] sm:$0xff]  ;;  %v27_v4 = vld [vmem:[%s434_s3 + $0x20] sm:$0xff]  ;;  %vm137_vm1 = vcmask 523264   ;;  %v318_v24 = vmov 0  }
   0x6   :  { %v26_v5 = vld [vmem:[%s434_s3 + $0x18] sm:$0xff]  ;;  %v25_v6 = vld [vmem:[%s434_s3 + $0x10] sm:$0xff]  ;;  %v24_v7 = vld [vmem:[%s434_s3 + $0x8] sm:$0xff]  ;;  %284 = vset.pattern.permute.xlu0 %v318_v24  ;;  %285 = vset.pattern.permute.xlu1 %v318_v24 }
   0x7   :  { %264 = vmatpush3.xpose.msk.msra.mxu0 %vm31_vm0, %v29_v1  ;;  %v23_v8 = vld [vmem:[%s434_s3] sm:$0xff]  ;;  %v22_v9 = vld [vmem:[%s431_s0 + $0x8] sm:$0xff] }
   0x8   :  { %265 = vmatprep.subr.msk.mxu0 %vm31_vm0, %v28_v3  ;;  %v158_v31 = vld [vmem:[%s432_s1] sm:$0xff]  ;;  %v159_v34 = vld [vmem:[%s432_s1 + $0x8] sm:$0xff] }
   0x9   :  { %v178_v37 = vld [vmem:[%s433_s2] sm:$0xff]  ;;  %v179_v38 = vld [vmem:[%s433_s2 + $0x8] sm:$0xff]  ;;  %s319_s2 = smov [#allocation2]  }
   0xa   :  { %v192_v44 = vld [vmem:[%s435_s4] sm:$0xff]  ;;  %v193_v46 = vld [vmem:[%s435_s4 + $0x8] sm:$0xff]  ;;  %s230_s4 = sshll.u32 %s319_s2, 4  ;;  %s231_s4 = int_to_ptr.vmem [resolvable:$true] %s230_s4 }
   0xb   :  { %266 = vmatpush3.xpose.msk.msra.mxu0 %vm31_vm0, %v28_v3  ;;  %s296_s22 = scalar_lea.vmem %s231_s4, 256  ;;  %p301_p1 = scmp.lt.s32.totalorder %s231_s4, %s231_s4 }
   0xc   :  { %267 = vmatprep.subr.msk.mxu0 %vm31_vm0, %v27_v4  ;;  %p297_p0 = scmp.ne.s32.totalorder %s231_s4, %s296_s22  ;;  %p302_p2 = scmp.lt.s32.totalorder %s296_s22, %s296_s22 }
   0xe   :  { %p303_p3 = por %p302_p2, %p301_p1 }
   0xf   :  { %268 = vmatpush3.xpose.msk.msra.mxu0 %vm31_vm0, %v27_v4 }
  0x10   :  { %269 = vmatprep.subr.msk.mxu0 %vm31_vm0, %v26_v5  ;;  %p304_p4 = pnand %p303_p3, %p297_p0 }
  0x13   :  { %270 = vmatpush3.xpose.msk.msra.mxu0 %vm31_vm0, %v26_v5 }
  0x14   :  { %271 = vmatprep.subr.msk.mxu0 %vm31_vm0, %v25_v6 }
  0x17   :  { %272 = vmatpush3.xpose.msk.msra.mxu0 %vm31_vm0, %v25_v6 }
  0x18   :  { %273 = vmatprep.subr.msk.mxu0 %vm31_vm0, %v24_v7 }
  0x1b   :  { %274 = vmatpush3.xpose.msk.msra.mxu0 %vm31_vm0, %v24_v7 }
  0x1c   :  { %275 = vmatprep.subr.msk.mxu0 %vm31_vm0, %v23_v8 }
  0x1f   :  { %276 = vmatpush3.xpose.msk.msra.mxu0 %vm31_vm0, %v23_v8 }
  0x22   :  { %278 = vmatmul.mubr.msk.f32.vlgmr.msra.gmra.mxu0 %vm31_vm0, %v22_v9 }
  0xe2   :  { %v279_v10 = vpop.f32.mrf.mxu0 }
  0xe3   :  { %v141_v13 = vsel %vm137_vm1, %v279_v10, 0.0 }
  0xe4   :  { %v128_v11 = vpop.f32.mrf.mxu0 }
  0xe5   :  { %v138_v12 = vsel %vm137_vm1, %v128_v11, 0.0 }
  0xe6   :  { %139 = vadd.xlane.f32.xlu0 %v138_v12 }
  0xea   :  { %142 = vadd.xlane.f32.xlu0 %v141_v13 }
 0x16f   :  { %v140_v14 = vpop.xlane.xlu0 %139 }
 0x170   :  { %v144_v15 = vmul.f32 0.015625, %v140_v14 }
 0x172   :  { %v146_v16 = vsub.f32 %v128_v11, %v144_v15 }
 0x173   :  { %v143_v17 = vpop.xlane.xlu0 %142 }
 0x174   :  { %v145_v18 = vmul.f32 0.015625, %v143_v17  ;;  %v148_v19 = vmul.f32 %v146_v16, %v146_v16 }
 0x176   :  { %v147_v20 = vsub.f32 %v279_v10, %v145_v18  ;;  %v150_v21 = vsel %vm137_vm1, %v148_v19, 0.0 }
 0x177   :  { %151 = vadd.xlane.f32.xlu1 %v150_v21 }
 0x178   :  { %v149_v22 = vmul.f32 %v147_v20, %v147_v20 }
 0x17a   :  { %v153_v23 = vsel %vm137_vm1, %v149_v22, 0.0 }
 0x17b   :  { %154 = vadd.xlane.f32.xlu1 %v153_v23 }
 0x200   :  { %v152_v25 = vpop.xlane.xlu1 %151 }
 0x201   :  { %v156_v26 = vmul.f32 0.015625, %v152_v25 }
 0x203   :  { %v160_v27 = vadd.f32 1e-05, %v156_v26 }
 0x204   :  { %v155_v28 = vpop.xlane.xlu1 %154 }
 0x205   :  { %286 = vrsqrt.f32 %v160_v27  ;;  %v157_v29 = vmul.f32 0.015625, %v155_v28 }
 0x207   :  { %v161_v30 = vadd.f32 1e-05, %v157_v29 }
 0x209   :  { %288 = vrsqrt.f32 %v161_v30 }
 0x212   :  { %v287_v32 = vpop.eup %286 }
 0x213   :  { %v164_v33 = vmul.f32 %v287_v32, %v158_v31 }
 0x215   :  { %168 = vperm.xlu0 %284, %v164_v33  }
 0x216   :  { %v289_v35 = vpop.eup %288 }
 0x217   :  { %v165_v36 = vmul.f32 %v289_v35, %v159_v34 }
 0x219   :  { %173 = vperm.xlu1 %285, %v165_v36  }
 0x21d   :  { %182 = vperm.xlu1 %285, %v178_v37  }
 0x221   :  { %187 = vperm.xlu1 %285, %v179_v38  }
 0x290   :  { %v169_v39 = vpop.permute.xlu0 %168 }
 0x291   :  { %v176_v41 = vmul.f32 %v169_v39, %v146_v16 }
 0x294   :  { %v174_v40 = vpop.permute.xlu1 %173 }
 0x295   :  { %v177_v45 = vmul.f32 %v174_v40, %v147_v20 }
 0x298   :  { %v183_v42 = vpop.permute.xlu1 %182 }
 0x299   :  { %v190_v43 = vadd.f32 %v183_v42, %v176_v41 }
 0x29b   :  { %v194_v48 = vmul.f32 %v192_v44, %v190_v43 }
 0x29c   :  { %v188_v47 = vpop.permute.xlu1 %187 }
 0x29d   :  { %v191_v49 = vadd.f32 %v188_v47, %v177_v45  ;;  %v196_v51 = vsel %vm137_vm1, %v194_v48, -inf }
 0x29f   :  { %v195_v50 = vmul.f32 %v193_v46, %v191_v49 }
 0x2a1   :  { %v197_v52 = vsel %vm137_vm1, %v195_v50, -inf }
 0x2a2   :  { %v198_v53 = vmax.f32 %v196_v51, %v197_v52 }
 0x2a4   :  { %v199_v54 = vrot.slane %v198_v53, 4 }
 0x2a6   :  { %v200_v55 = vmax.f32 %v198_v53, %v199_v54 }
 0x2a8   :  { %v201_v56 = vrot.slane %v200_v55, 2 }
 0x2aa   :  { %v202_v57 = vmax.f32 %v200_v55, %v201_v56 }
 0x2ac   :  { %v203_v58 = vrot.slane %v202_v57, 1 }
 0x2ae   :  { %v204_v59 = vmax.f32 %v202_v57, %v203_v58 }
 0x2b0   :  { %v205_v60 = vsub.f32 %v194_v48, %v204_v59  ;;  %v206_v61 = vsub.f32 %v195_v50, %v204_v59 }
 0x2b2   :  { %v207_v62 = vmul.f32 1.442695, %v205_v60  ;;  %v209_v63 = vmul.f32 1.442695, %v206_v61 }
 0x2b4   :  { %290 = vpow2.f32 %v207_v62 }
 0x2b5   :  { %292 = vpow2.f32 %v209_v63 }
 0x2c1   :  { %v291_v0 = vpop.eup %290 }
 0x2c2   :  { %v293_v1 = vpop.eup %292  ;;  %v211_v2 = vsel %vm137_vm1, %v291_v0, 0.0 }
 0x2c3   :  { %v212_v3 = vsel %vm137_vm1, %v293_v1, 0.0 }
 0x2c4   :  { %v213_v4 = vadd.f32 %v212_v3, %v211_v2 }
 0x2c6   :  { %v214_v5 = vrot.slane %v213_v4, 4 }
 0x2c8   :  { %v215_v6 = vadd.f32 %v214_v5, %v213_v4 }
 0x2ca   :  { %v216_v7 = vrot.slane %v215_v6, 2 }
 0x2cc   :  { %v217_v8 = vadd.f32 %v216_v7, %v215_v6 }
 0x2ce   :  { %v218_v9 = vrot.slane %v217_v8, 1 }
 0x2d0   :  { %v219_v10 = vadd.f32 %v218_v9, %v217_v8 }
 0x2d2   :  { %294 = vrcp.f32 %v219_v10 }
 0x2df   :  { %v295_v11 = vpop.eup %294 }
 0x2e0   :  { %v221_v12 = vmul.f32 %v295_v11, %v291_v0  ;;  %v222_v13 = vmul.f32 %v295_v11, %v293_v1 }
 0x2e2   :  { %223 = vst.msk [vmem:[#allocation2] sm:$0xff] %vm137_vm1, %v221_v12  ;;  %224 = vst.msk [vmem:[#allocation2 + $0x8] sm:$0xff] %vm137_vm1, %v222_v13 }
 0x2e3   :  { %307 = shalt.err (!%p304_p4)
}
 0x2e4   :  { %s320_s23 = smov 128   ;;  %s321_s24 = smov 8  }
 0x2e5   :  { %236 = dma.vmem_to_hbm [thread:$0]  %s231_s4, 256, %s436_s5, [#allocation3], %s320_s23, %s320_s23, %s321_s24  }
 0x2e6   :  { %316 = dma.done.wait [#allocation3], 256  }
 0x2e7   :  { %317 = vsyncadd [#allocation3], 4294967040 }
 0x2e8   :  { %240 = vsyncpa [#allocation3], 1 }

</bundles_post_ra>
